<compile_context>
chip_gen: v6e
topology: v6e:2x2x1
jax: 0.10.0
libtpu: 0.0.40
codegen_flags: <defaults>
</compile_context>

<pallas_src>
import functools

import jax
import jax.numpy as jnp
from jax.experimental import pallas as pl
from jax.experimental.pallas import tpu as pltpu

_LANE = 128
_SUBLANE = 8
_DEFAULT_TILE_TARGET = 2048     # rows per grid step (amortizes per-step overhead)


# TODO(synk): `remove_torque(x)` is not defined in the reference module; identity.
def remove_torque(x):
    return x


def _round_up(n, m):
    return ((n + m - 1) // m) * m


def _chip_info():
    """Returns (num_tensorcores, per-TC VMEM budget bytes, bf16-native VPU?)."""
    kind = ""
    try:
        kind = jax.devices()[0].device_kind.lower()
    except Exception:
        pass
    is_v7 = ("v7" in kind) or ("7x" in kind)
    multi_tc = is_v7 or ("v4" in kind)          # chips exposing 2 TCs per device
    bf16_vpu = ("v6" in kind) or is_v7          # v6e/v7x VALUs are bf16-native
    # Physical VMEM per TensorCore: 64 MiB on v7x, 128 MiB on v5e/v6e.
    vmem_budget = (40 << 20) if is_v7 else (96 << 20)
    num_tc = 2 if multi_tc else 1
    return num_tc, vmem_budget, bf16_vpu


def _mlp_kernel(n_layers, hidden_dtype, precision, x_ref, *refs):
    """Fused padded-MLP forward.

    refs = (w0, b0, w1, b1, ..., w_{L-1}, b_{L-1}, out_ref).
    Hidden layers: relu(x @ W + b), bias-add/ReLU in `hidden_dtype` (bf16 on
    v6e/v7x, f32 otherwise).  Last layer: tanh(x @ W + b) in f32.
    MXU accumulation is always f32 via preferred_element_type.
    """
    out_ref = refs[-1]
    param_refs = refs[:-1]

    h = x_ref[...]
    for layer in range(n_layers):
        w_ref = param_refs[2 * layer]
        b_ref = param_refs[2 * layer + 1]
        acc = jnp.dot(h.astype(w_ref.dtype), w_ref[...],
                      preferred_element_type=jnp.float32,
                      precision=precision)
        if layer < n_layers - 1:
            # Hidden layer: bias-add + ReLU on the VPU (bf16 path on v6e/v7x).
            h = jnp.maximum(acc.astype(hidden_dtype) + b_ref[...], 0)
        else:
            # Output layer: f32 bias-add + tanh (EUP), f32 writeback.
            h = jnp.tanh(acc + b_ref[...])
    out_ref[...] = h.astype(out_ref.dtype)


def _choose_batch_tile(B, max_rows, num_tc, target):
    """Largest divisor of B that is a multiple of 8 and fits the caps.

    On multi-TC chips additionally cap at B//2 so the "parallel" batch axis has
    >= 2 grid steps to shard across TensorCores.  Single-TC chips (v5e/v6e) take
    the whole batch in one step whenever it fits (grid is a serial loop there).
    Falls back to a single full-extent block when B has no suitable divisor.
    """
    if B <= _SUBLANE:
        return B
    cap = min(B, target, max(max_rows, _SUBLANE))
    if num_tc >= 2 and B % 2 == 0 and (B // 2) >= _SUBLANE:
        cap = min(cap, B // 2)
    t = (cap // _SUBLANE) * _SUBLANE
    while t >= _SUBLANE:
        if B % t == 0:
            return t
        t -= _SUBLANE
    return B     # no multiple-of-8 divisor: single full-extent block


def actor_p_forward(x, weights, biases, *, batch_tile=None,
                    matmul_dtype=jnp.bfloat16, precision=None,
                    single_buffer_params=True, tile_target=_DEFAULT_TILE_TARGET):
    """ActorP forward with one fused pallas_call.

    x:       [B, in_features] float32
    weights: list of [in_i, out_i] float32 (transposed vs. torch's [out, in])
    biases:  list of [out_i] or [1, out_i] float32
    precision: optional lax.Precision for the matmuls (e.g. HIGHEST to match a
               precision-pinned f32 oracle); None = default.
    """
    x = remove_torque(x)
    B, in_features = x.shape
    n_layers = len(weights)
    out_features = weights[-1].shape[1]

    num_tc, vmem_budget, bf16_vpu = _chip_info()
    is_bf16 = jnp.dtype(matmul_dtype) == jnp.dtype(jnp.bfloat16)
    # bf16 elementwise only where the VPU is bf16-native (v6e/v7x); f32 on v5e.
    hidden_dtype = jnp.bfloat16 if (is_bf16 and bf16_vpu) else jnp.float32
    x_dtype = jnp.bfloat16 if is_bf16 else jnp.float32   # halves x-in HBM bytes

    # ---- pad every feature dim to a multiple of 128 lanes (exact) ----------
    dims = [in_features] + [w.shape[1] for w in weights]
    pdims = [_round_up(d, _LANE) for d in dims]

    x_p = jnp.pad(x.astype(jnp.float32),
                  ((0, 0), (0, pdims[0] - in_features))).astype(x_dtype)
    params = []
    for li, (w, b) in enumerate(zip(weights, biases)):
        b2 = jnp.reshape(b, (1, -1)).astype(jnp.float32)
        w_p = jnp.pad(w.astype(jnp.float32),
                      ((0, pdims[li] - w.shape[0]),
                       (0, pdims[li + 1] - w.shape[1])))
        b_p = jnp.pad(b2, ((0, 0), (0, pdims[li + 1] - b2.shape[1])))
        b_dtype = hidden_dtype if li < n_layers - 1 else jnp.float32
        params.extend([w_p.astype(matmul_dtype), b_p.astype(b_dtype)])

    # ---- per-TC VMEM accounting (block buffers + intermediates + fudge) ----
    w_itemsize = jnp.dtype(matmul_dtype).itemsize
    x_itemsize = jnp.dtype(x_dtype).itemsize
    wb = 1 if single_buffer_params else 2                 # weight/bias buffer count
    max_d = max(pdims)
    fixed_bytes = (
        wb * sum(pdims[i] * pdims[i + 1] for i in range(n_layers)) * w_itemsize
        + wb * sum(pdims[i + 1] for i in range(n_layers)) * 4
        + (2 << 20))                                      # Mosaic-internal scratch
    per_row_bytes = (
        2 * pdims[0] * x_itemsize                         # x (double-buffered)
        + 2 * pdims[-1] * 4                               # out (double-buffered)
        + 4 * max_d * 4)                                  # live f32 intermediates
    max_rows = max(_SUBLANE, (vmem_budget - fixed_bytes) // per_row_bytes)

    # ---- batch tiling -------------------------------------------------------
    if batch_tile is None:
        batch_tile = _choose_batch_tile(B, max_rows, num_tc, tile_target)
    assert B % batch_tile == 0, "batch_tile must evenly divide the batch"
    assert batch_tile == B or batch_tile % _SUBLANE == 0, (
        "batch_tile must be a multiple of 8 (f32 sublane tile) unless it covers "
        "the whole batch")
    grid = (B // batch_tile,)

    vmem_estimate = fixed_bytes + batch_tile * per_row_bytes
    if vmem_estimate > vmem_budget:
        raise ValueError(
            f"per-step VMEM estimate {vmem_estimate} B exceeds per-TC budget "
            f"{vmem_budget} B; lower batch_tile")
    vmem_limit = int(min(vmem_budget, max(32 << 20, 2 * vmem_estimate)))

    # ---- scheduler hint ------------------------------------------------------
    flops = 2 * B * sum(pdims[i] * pdims[i + 1] for i in range(n_layers))
    bytes_accessed = (
        B * pdims[0] * x_itemsize + B * pdims[-1] * 4
        + sum(pdims[i] * pdims[i + 1] * w_itemsize for i in range(n_layers))
        + sum(pdims[i + 1] * 4 for i in range(n_layers)))
    cost = pl.CostEstimate(flops=flops, transcendentals=B * pdims[-1],
                           bytes_accessed=bytes_accessed)

    out_shape = jax.ShapeDtypeStruct((B, pdims[-1]), jnp.float32)
    compiler_params = pltpu.CompilerParams(
        dimension_semantics=("parallel",), vmem_limit_bytes=vmem_limit)

    def _run(single_buffer):
        # Weights/biases are grid-invariant (index_map always (0, 0)):
        # single-buffer them so they don't pay 2x VMEM for no reason.
        pipe = dict(pipeline_mode=pl.Buffered(1)) if single_buffer else {}
        in_specs = [pl.BlockSpec((batch_tile, pdims[0]), lambda i: (i, 0))]
        for li in range(n_layers):
            in_specs.append(
                pl.BlockSpec((pdims[li], pdims[li + 1]), lambda i: (0, 0), **pipe))
            in_specs.append(
                pl.BlockSpec((1, pdims[li + 1]), lambda i: (0, 0), **pipe))
        out_spec = pl.BlockSpec((batch_tile, pdims[-1]), lambda i: (i, 0))
        return pl.pallas_call(
            functools.partial(_mlp_kernel, n_layers, hidden_dtype, precision),
            out_shape=out_shape,
            grid=grid,
            in_specs=in_specs,
            out_specs=out_spec,
            compiler_params=compiler_params,
            cost_estimate=cost,
        )(x_p, *params)

    if single_buffer_params:
        try:
            out_padded = _run(True)
        except Exception:
            # Fallback if this JAX/Mosaic build rejects Buffered(1) blocks.
            out_padded = _run(False)
    else:
        out_padded = _run(False)

    return out_padded[:, :out_features]


def init_actor_p_params(key, config_array):
    """Deterministic init mirroring nn.Linear default (uniform +-1/sqrt(fan_in)).

    Returns weights as [in, out] (transposed vs. torch's [out, in]) and biases
    as [1, out].
    """
    weights, biases = [], []
    for fan_in, fan_out in zip(config_array[:-1], config_array[1:]):
        key, kw, kb = jax.random.split(key, 3)
        bound = 1.0 / jnp.sqrt(float(fan_in))
        w = jax.random.uniform(kw, (fan_in, fan_out), jnp.float32, -bound, bound)
        b = jax.random.uniform(kb, (1, fan_out), jnp.float32, -bound, bound)
        weights.append(w)
        biases.append(b)
    return weights, biases


def actor_p_reference(x, weights, biases):
    h = remove_torque(x)
    hp = jax.lax.Precision.HIGHEST
    for w, b in zip(weights[:-1], biases[:-1]):
        h = jnp.maximum(jnp.dot(h, w, precision=hp) + jnp.reshape(b, (1, -1)), 0.0)
    return jnp.tanh(jnp.dot(h, weights[-1], precision=hp)
                    + jnp.reshape(biases[-1], (1, -1)))


if __name__ == "__main__":
    # config_array: [in_features, hidden, hidden, out_features]
    config_array = [32, 64, 64, 16]

    key = jax.random.PRNGKey(0)
    key, kp = jax.random.split(key)
    weights, biases = init_actor_p_params(kp, config_array)

    # Small batch: single grid step on every chip.
    key, kx = jax.random.split(key)
    x_small = jax.random.normal(kx, (8, config_array[0]), jnp.float32)
    ref_small = actor_p_reference(x_small, weights, biases)

    # f32 MXU-operand path: must match the f32 reference tightly.
    out_f32 = jax.block_until_ready(
        actor_p_forward(x_small, weights, biases, matmul_dtype=jnp.float32))
    assert out_f32.shape == (8, config_array[-1])
    assert jnp.allclose(out_f32, ref_small, atol=1e-4, rtol=1e-4), "f32 mismatch"

    # Default bf16-MXU (+ bf16 elementwise on v6e/v7x) path: looser tolerance.
    out_bf16 = jax.block_until_ready(actor_p_forward(x_small, weights, biases))
    assert out_bf16.shape == (8, config_array[-1])
    assert jnp.allclose(out_bf16, ref_small, atol=5e-2, rtol=5e-2), "bf16 mismatch"

    # Larger batch: single big tile on v5e/v6e, >=2 "parallel" steps on v4/v7x.
    key, kx2 = jax.random.split(key)
    x_big = jax.random.normal(kx2, (64, config_array[0]), jnp.float32)
    out_big = jax.block_until_ready(actor_p_forward(x_big, weights, biases))
    ref_big = actor_p_reference(x_big, weights, biases)
    assert out_big.shape == (64, config_array[-1])
    assert jnp.allclose(out_big, ref_big, atol=5e-2, rtol=5e-2), "tiled mismatch"

    print("KERNEL_OK")
</pallas_src>

<mosaic_0001>
module attributes {stable_mosaic.version = 11 : i64} {
  func.func @_mlp_kernel(%arg0: i32, %arg1: memref<8x128xf32, #tpu.memory_space<vmem>>, %arg2: memref<128x128xf32, #tpu.memory_space<vmem>>, %arg3: memref<1x128xf32, #tpu.memory_space<vmem>>, %arg4: memref<128x128xf32, #tpu.memory_space<vmem>>, %arg5: memref<1x128xf32, #tpu.memory_space<vmem>>, %arg6: memref<128x128xf32, #tpu.memory_space<vmem>>, %arg7: memref<1x128xf32, #tpu.memory_space<vmem>>, %arg8: memref<8x128xf32, #tpu.memory_space<vmem>>) attributes {dimension_semantics = [#tpu.dimension_semantics<parallel>], iteration_bounds = array<i64: 1>, scalar_prefetch = 0 : i64, scratch_operands = 0 : i64, tpu.core_type = #tpu.core_type<tc>, window_params = [{transform_indices = @transform_0, window_bounds = array<i64: 8, 128>}, {pipeline_mode = #tpu.pipeline_mode<synchronous>, transform_indices = @transform_1, window_bounds = array<i64: 128, 128>}, {pipeline_mode = #tpu.pipeline_mode<synchronous>, transform_indices = @transform_2, window_bounds = array<i64: 1, 128>}, {pipeline_mode = #tpu.pipeline_mode<synchronous>, transform_indices = @transform_3, window_bounds = array<i64: 128, 128>}, {pipeline_mode = #tpu.pipeline_mode<synchronous>, transform_indices = @transform_4, window_bounds = array<i64: 1, 128>}, {pipeline_mode = #tpu.pipeline_mode<synchronous>, transform_indices = @transform_5, window_bounds = array<i64: 128, 128>}, {pipeline_mode = #tpu.pipeline_mode<synchronous>, transform_indices = @transform_6, window_bounds = array<i64: 1, 128>}, {transform_indices = @transform_7, window_bounds = array<i64: 8, 128>}]} {
    %c0 = arith.constant 0 : index
    %c0_0 = arith.constant 0 : index
    %0 = vector.load %arg1[%c0, %c0_0] : memref<8x128xf32, #tpu.memory_space<vmem>>, vector<8x128xf32>
    %c0_1 = arith.constant 0 : index
    %c0_2 = arith.constant 0 : index
    %1 = vector.load %arg2[%c0_1, %c0_2] : memref<128x128xf32, #tpu.memory_space<vmem>>, vector<128x128xf32>
    %cst = arith.constant dense<0.000000e+00> : vector<8x128xf32>
    %2 = tpu.matmul %0, %1, %cst {dimension_numbers = #tpu.dot_dimension_numbers<[1], [0], [0], [1], [0, 0, 1, 1], [], []>} : vector<8x128xf32>, vector<128x128xf32>, vector<8x128xf32> -> vector<8x128xf32>
    %c0_3 = arith.constant 0 : index
    %c0_4 = arith.constant 0 : index
    %3 = vector.load %arg3[%c0_3, %c0_4] : memref<1x128xf32, #tpu.memory_space<vmem>>, vector<1x128xf32>
    %4 = vector.broadcast %3 : vector<1x128xf32> to vector<8x128xf32>
    %5 = arith.addf %2, %4 : vector<8x128xf32>
    %cst_5 = arith.constant 0.000000e+00 : f32
    %6 = vector.broadcast %cst_5 : f32 to vector<8x128xf32>
    %7 = arith.maximumf %5, %6 : vector<8x128xf32>
    %c0_6 = arith.constant 0 : index
    %c0_7 = arith.constant 0 : index
    %8 = vector.load %arg4[%c0_6, %c0_7] : memref<128x128xf32, #tpu.memory_space<vmem>>, vector<128x128xf32>
    %cst_8 = arith.constant dense<0.000000e+00> : vector<8x128xf32>
    %9 = tpu.matmul %7, %8, %cst_8 {dimension_numbers = #tpu.dot_dimension_numbers<[1], [0], [0], [1], [0, 0, 1, 1], [], []>} : vector<8x128xf32>, vector<128x128xf32>, vector<8x128xf32> -> vector<8x128xf32>
    %c0_9 = arith.constant 0 : index
    %c0_10 = arith.constant 0 : index
    %10 = vector.load %arg5[%c0_9, %c0_10] : memref<1x128xf32, #tpu.memory_space<vmem>>, vector<1x128xf32>
    %11 = vector.broadcast %10 : vector<1x128xf32> to vector<8x128xf32>
    %12 = arith.addf %9, %11 : vector<8x128xf32>
    %cst_11 = arith.constant 0.000000e+00 : f32
    %13 = vector.broadcast %cst_11 : f32 to vector<8x128xf32>
    %14 = arith.maximumf %12, %13 : vector<8x128xf32>
    %c0_12 = arith.constant 0 : index
    %c0_13 = arith.constant 0 : index
    %15 = vector.load %arg6[%c0_12, %c0_13] : memref<128x128xf32, #tpu.memory_space<vmem>>, vector<128x128xf32>
    %cst_14 = arith.constant dense<0.000000e+00> : vector<8x128xf32>
    %16 = tpu.matmul %14, %15, %cst_14 {dimension_numbers = #tpu.dot_dimension_numbers<[1], [0], [0], [1], [0, 0, 1, 1], [], []>} : vector<8x128xf32>, vector<128x128xf32>, vector<8x128xf32> -> vector<8x128xf32>
    %c0_15 = arith.constant 0 : index
    %c0_16 = arith.constant 0 : index
    %17 = vector.load %arg7[%c0_15, %c0_16] : memref<1x128xf32, #tpu.memory_space<vmem>>, vector<1x128xf32>
    %18 = vector.broadcast %17 : vector<1x128xf32> to vector<8x128xf32>
    %19 = arith.addf %16, %18 : vector<8x128xf32>
    %20 = math.tanh %19 : vector<8x128xf32>
    %c0_17 = arith.constant 0 : index
    %c0_18 = arith.constant 0 : index
    %21 = vector.load %arg8[%c0_17, %c0_18] : memref<8x128xf32, #tpu.memory_space<vmem>>, vector<8x128xf32>
    tpu.vector_store %arg8[%c0_17, %c0_18], %20 {strides = array<i32>} : memref<8x128xf32, #tpu.memory_space<vmem>>, vector<8x128xf32>,
    return
  }
  func.func @transform_0(%arg0: i32) -> (i32, i32) {
    %c0_i32 = arith.constant 0 : i32
    %c0_i32_0 = arith.constant 0 : i32
    return %arg0, %c0_i32 : i32, i32
  }
  func.func @transform_1(%arg0: i32) -> (i32, i32) {
    %c0_i32 = arith.constant 0 : i32
    %c0_i32_0 = arith.constant 0 : i32
    %c0_i32_1 = arith.constant 0 : i32
    return %c0_i32, %c0_i32_0 : i32, i32
  }
  func.func @transform_2(%arg0: i32) -> (i32, i32) {
    %c0_i32 = arith.constant 0 : i32
    %c0_i32_0 = arith.constant 0 : i32
    %c0_i32_1 = arith.constant 0 : i32
    return %c0_i32, %c0_i32_0 : i32, i32
  }
  func.func @transform_3(%arg0: i32) -> (i32, i32) {
    %c0_i32 = arith.constant 0 : i32
    %c0_i32_0 = arith.constant 0 : i32
    %c0_i32_1 = arith.constant 0 : i32
    return %c0_i32, %c0_i32_0 : i32, i32
  }
  func.func @transform_4(%arg0: i32) -> (i32, i32) {
    %c0_i32 = arith.constant 0 : i32
    %c0_i32_0 = arith.constant 0 : i32
    %c0_i32_1 = arith.constant 0 : i32
    return %c0_i32, %c0_i32_0 : i32, i32
  }
  func.func @transform_5(%arg0: i32) -> (i32, i32) {
    %c0_i32 = arith.constant 0 : i32
    %c0_i32_0 = arith.constant 0 : i32
    %c0_i32_1 = arith.constant 0 : i32
    return %c0_i32, %c0_i32_0 : i32, i32
  }
  func.func @transform_6(%arg0: i32) -> (i32, i32) {
    %c0_i32 = arith.constant 0 : i32
    %c0_i32_0 = arith.constant 0 : i32
    %c0_i32_1 = arith.constant 0 : i32
    return %c0_i32, %c0_i32_0 : i32, i32
  }
  func.func @transform_7(%arg0: i32) -> (i32, i32) {
    %c0_i32 = arith.constant 0 : i32
    %c0_i32_0 = arith.constant 0 : i32
    return %arg0, %c0_i32 : i32, i32
  }
}

module attributes {stable_mosaic.version = 11 : i64} {
  func.func @_mlp_kernel(%arg0: i32, %arg1: memref<8x128xf32, #tpu.memory_space<vmem>>, %arg2: memref<128x128xf32, #tpu.memory_space<vmem>>, %arg3: memref<1x128xf32, #tpu.memory_space<vmem>>, %arg4: memref<128x128xf32, #tpu.memory_space<vmem>>, %arg5: memref<1x128xf32, #tpu.memory_space<vmem>>, %arg6: memref<128x128xf32, #tpu.memory_space<vmem>>, %arg7: memref<1x128xf32, #tpu.memory_space<vmem>>, %arg8: memref<8x128xf32, #tpu.memory_space<vmem>>) attributes {dimension_semantics = [#tpu.dimension_semantics<parallel>], iteration_bounds = array<i64: 1>, scalar_prefetch = 0 : i64, scratch_operands = 0 : i64, tpu.core_type = #tpu.core_type<tc>, window_params = [{transform_indices = @transform_0, window_bounds = array<i64: 8, 128>}, {pipeline_mode = #tpu.pipeline_mode<synchronous>, transform_indices = @transform_1, window_bounds = array<i64: 128, 128>}, {pipeline_mode = #tpu.pipeline_mode<synchronous>, transform_indices = @transform_2, window_bounds = array<i64: 1, 128>}, {pipeline_mode = #tpu.pipeline_mode<synchronous>, transform_indices = @transform_3, window_bounds = array<i64: 128, 128>}, {pipeline_mode = #tpu.pipeline_mode<synchronous>, transform_indices = @transform_4, window_bounds = array<i64: 1, 128>}, {pipeline_mode = #tpu.pipeline_mode<synchronous>, transform_indices = @transform_5, window_bounds = array<i64: 128, 128>}, {pipeline_mode = #tpu.pipeline_mode<synchronous>, transform_indices = @transform_6, window_bounds = array<i64: 1, 128>}, {transform_indices = @transform_7, window_bounds = array<i64: 8, 128>}]} {
    %c0 = arith.constant 0 : index
    %c0_0 = arith.constant 0 : index
    %0 = vector.load %arg1[%c0, %c0_0] : memref<8x128xf32, #tpu.memory_space<vmem>>, vector<8x128xf32>
    %c0_1 = arith.constant 0 : index
    %c0_2 = arith.constant 0 : index
    %1 = vector.load %arg2[%c0_1, %c0_2] : memref<128x128xf32, #tpu.memory_space<vmem>>, vector<128x128xf32>
    %cst = arith.constant dense<0.000000e+00> : vector<8x128xf32>
    %2 = tpu.matmul %0, %1, %cst {dimension_numbers = #tpu.dot_dimension_numbers<[1], [0], [0], [1], [0, 0, 1, 1], [], []>} : vector<8x128xf32>, vector<128x128xf32>, vector<8x128xf32> -> vector<8x128xf32>
    %c0_3 = arith.constant 0 : index
    %c0_4 = arith.constant 0 : index
    %3 = vector.load %arg3[%c0_3, %c0_4] : memref<1x128xf32, #tpu.memory_space<vmem>>, vector<1x128xf32>
    %4 = vector.broadcast %3 : vector<1x128xf32> to vector<8x128xf32>
    %5 = arith.addf %2, %4 : vector<8x128xf32>
    %cst_5 = arith.constant 0.000000e+00 : f32
    %6 = vector.broadcast %cst_5 : f32 to vector<8x128xf32>
    %7 = arith.maximumf %5, %6 : vector<8x128xf32>
    %c0_6 = arith.constant 0 : index
    %c0_7 = arith.constant 0 : index
    %8 = vector.load %arg4[%c0_6, %c0_7] : memref<128x128xf32, #tpu.memory_space<vmem>>, vector<128x128xf32>
    %cst_8 = arith.constant dense<0.000000e+00> : vector<8x128xf32>
    %9 = tpu.matmul %7, %8, %cst_8 {dimension_numbers = #tpu.dot_dimension_numbers<[1], [0], [0], [1], [0, 0, 1, 1], [], []>} : vector<8x128xf32>, vector<128x128xf32>, vector<8x128xf32> -> vector<8x128xf32>
    %c0_9 = arith.constant 0 : index
    %c0_10 = arith.constant 0 : index
    %10 = vector.load %arg5[%c0_9, %c0_10] : memref<1x128xf32, #tpu.memory_space<vmem>>, vector<1x128xf32>
    %11 = vector.broadcast %10 : vector<1x128xf32> to vector<8x128xf32>
    %12 = arith.addf %9, %11 : vector<8x128xf32>
    %cst_11 = arith.constant 0.000000e+00 : f32
    %13 = vector.broadcast %cst_11 : f32 to vector<8x128xf32>
    %14 = arith.maximumf %12, %13 : vector<8x128xf32>
    %c0_12 = arith.constant 0 : index
    %c0_13 = arith.constant 0 : index
    %15 = vector.load %arg6[%c0_12, %c0_13] : memref<128x128xf32, #tpu.memory_space<vmem>>, vector<128x128xf32>
    %cst_14 = arith.constant dense<0.000000e+00> : vector<8x128xf32>
    %16 = tpu.matmul %14, %15, %cst_14 {dimension_numbers = #tpu.dot_dimension_numbers<[1], [0], [0], [1], [0, 0, 1, 1], [], []>} : vector<8x128xf32>, vector<128x128xf32>, vector<8x128xf32> -> vector<8x128xf32>
    %c0_15 = arith.constant 0 : index
    %c0_16 = arith.constant 0 : index
    %17 = vector.load %arg7[%c0_15, %c0_16] : memref<1x128xf32, #tpu.memory_space<vmem>>, vector<1x128xf32>
    %18 = vector.broadcast %17 : vector<1x128xf32> to vector<8x128xf32>
    %19 = arith.addf %16, %18 : vector<8x128xf32>
    %20 = math.tanh %19 : vector<8x128xf32>
    %c0_17 = arith.constant 0 : index
    %c0_18 = arith.constant 0 : index
    %21 = vector.load %arg8[%c0_17, %c0_18] : memref<8x128xf32, #tpu.memory_space<vmem>>, vector<8x128xf32>
    tpu.vector_store %arg8[%c0_17, %c0_18], %20 {strides = array<i32>} : memref<8x128xf32, #tpu.memory_space<vmem>>, vector<8x128xf32>,
    return
  }
  func.func @transform_0(%arg0: i32) -> (i32, i32) {
    %c0_i32 = arith.constant 0 : i32
    %c0_i32_0 = arith.constant 0 : i32
    return %arg0, %c0_i32 : i32, i32
  }
  func.func @transform_1(%arg0: i32) -> (i32, i32) {
    %c0_i32 = arith.constant 0 : i32
    %c0_i32_0 = arith.constant 0 : i32
    %c0_i32_1 = arith.constant 0 : i32
    return %c0_i32, %c0_i32_0 : i32, i32
  }
  func.func @transform_2(%arg0: i32) -> (i32, i32) {
    %c0_i32 = arith.constant 0 : i32
    %c0_i32_0 = arith.constant 0 : i32
    %c0_i32_1 = arith.constant 0 : i32
    return %c0_i32, %c0_i32_0 : i32, i32
  }
  func.func @transform_3(%arg0: i32) -> (i32, i32) {
    %c0_i32 = arith.constant 0 : i32
    %c0_i32_0 = arith.constant 0 : i32
    %c0_i32_1 = arith.constant 0 : i32
    return %c0_i32, %c0_i32_0 : i32, i32
  }
  func.func @transform_4(%arg0: i32) -> (i32, i32) {
    %c0_i32 = arith.constant 0 : i32
    %c0_i32_0 = arith.constant 0 : i32
    %c0_i32_1 = arith.constant 0 : i32
    return %c0_i32, %c0_i32_0 : i32, i32
  }
  func.func @transform_5(%arg0: i32) -> (i32, i32) {
    %c0_i32 = arith.constant 0 : i32
    %c0_i32_0 = arith.constant 0 : i32
    %c0_i32_1 = arith.constant 0 : i32
    return %c0_i32, %c0_i32_0 : i32, i32
  }
  func.func @transform_6(%arg0: i32) -> (i32, i32) {
    %c0_i32 = arith.constant 0 : i32
    %c0_i32_0 = arith.constant 0 : i32
    %c0_i32_1 = arith.constant 0 : i32
    return %c0_i32, %c0_i32_0 : i32, i32
  }
  func.func @transform_7(%arg0: i32) -> (i32, i32) {
    %c0_i32 = arith.constant 0 : i32
    %c0_i32_0 = arith.constant 0 : i32
    return %arg0, %c0_i32 : i32, i32
  }
}

</mosaic_0001>

<bundles_post_ra>
// kernel: tpu_custom_call.1
= control target key start
LH: loop header
LB: loop body
LE: loop exit
PB: predicated region body
PF: predicated region fallthrough
CT: control target
= control target key end

     0   :  { %12 = vsyncpa [#allocation3], 0  ;;  %s795_s0 = inlined_call_operand.hbm [shape: f32[8,128], index: 0, kind: input, shape index: {}]   ;;  %s796_s1 = inlined_call_operand.hbm [shape: f32[128,128], index: 1, kind: input, shape index: {}]   ;;  %s797_s2 = inlined_call_operand.vmem [shape: f32[1,128], index: 2, kind: input, shape index: {}]   ;;  %s798_s3 = inlined_call_operand.hbm [shape: f32[128,128], index: 3, kind: input, shape index: {}]   ;;  %s799_s4 = inlined_call_operand.vmem [shape: f32[1,128], index: 4, kind: input, shape index: {}]   ;;  %s800_s5 = inlined_call_operand.hbm [shape: f32[128,128], index: 5, kind: input, shape index: {}]   ;;  %s801_s6 = inlined_call_operand.vmem [shape: f32[1,128], index: 6, kind: input, shape index: {}]   ;;  %s802_s7 = inlined_call_operand.hbm [shape: f32[8,128], index: 7, kind: output, shape index: {}]  }
   0x1   :  { %13 = vsyncpa [#allocation6], 0 }
   0x2   :  { %14 = vsyncpa [#allocation9], 0 }
   0x3   :  { %15 = vsyncpa [#allocation4], 0  ;;  %s659_s24 = smov [#allocation5]  }
   0x4   :  { %s31_s25 = sshll.u32 %s659_s24, 4  ;;  %s32_s25 = int_to_ptr.vmem [resolvable:$true] %s31_s25 }
   0x5   :  { %s559_s26 = scalar_lea.vmem %s32_s25, 2048  ;;  %p564_p1 = scmp.lt.s32.totalorder %s32_s25, %s32_s25 }
   0x6   :  { %p560_p0 = scmp.ne.s32.totalorder %s32_s25, %s559_s26  ;;  %p565_p2 = scmp.lt.s32.totalorder %s559_s26, %s559_s26 }
   0x8   :  { %p566_p3 = por %p565_p2, %p564_p1 }
   0xa   :  { %p567_p4 = pnand %p566_p3, %p560_p0 }
   0xc   :  { %570 = shalt.err (!%p567_p4)
}
   0xd   :  { %s660_s27 = smov 128   ;;  %s661_s28 = smov 8  }
   0xe   :  { %37 = dma.hbm_to_vmem [thread:$0]  %s796_s1, 2048, %s32_s25, [#allocation6], %s660_s27, %s660_s27, %s661_s28  }
   0xf   :  { %s662_s8 = smov [#allocation2]   ;;  %s663_s10 = smov [#allocation7]  }
  0x10   :  { %s22_s9 = sshll.u32 %s662_s8, 4  ;;  %s45_s11 = sshll.u32 %s663_s10, 4  ;;  %s23_s9 = int_to_ptr.vmem [resolvable:$true] %s22_s9  ;;  %s46_s11 = int_to_ptr.vmem [resolvable:$true] %s45_s11 }
  0x11   :  { %s579_s12 = scalar_lea.vmem %s23_s9, 128  ;;  %p584_p6 = scmp.lt.s32.totalorder %s23_s9, %s23_s9 }
  0x12   :  { %p580_p5 = scmp.ne.s32.totalorder %s23_s9, %s579_s12  ;;  %p585_p7 = scmp.lt.s32.totalorder %s579_s12, %s579_s12 }
  0x14   :  { %p586_p8 = por %p585_p7, %p584_p6 }
  0x16   :  { %p587_p9 = pnand %p586_p8, %p580_p5 }
  0x18   :  { %590 = shalt.err (!%p587_p9)
}
  0x19   :  { %25 = dma.hbm_to_vmem [thread:$0]  %s795_s0, 128, %s23_s9, [#allocation3]  }
  0x1a   :  { %s599_s15 = scalar_lea.vmem %s46_s11, 2048  ;;  %p604_p11 = scmp.lt.s32.totalorder %s46_s11, %s46_s11 }
  0x1b   :  { %p600_p10 = scmp.ne.s32.totalorder %s46_s11, %s599_s15  ;;  %p605_p12 = scmp.lt.s32.totalorder %s599_s15, %s599_s15 }
  0x1d   :  { %p606_p13 = por %p605_p12, %p604_p11 }
  0x1f   :  { %p607_p0 = pnand %p606_p13, %p600_p10 }
  0x21   :  { %610 = shalt.err (!%p607_p0)
}
  0x22   :  { %51 = dma.hbm_to_vmem [thread:$0]  %s798_s3, 2048, %s46_s11, [#allocation6], %s660_s27, %s660_s27, %s661_s28  }
  0x23   :  { %s664_s17 = smov [#allocation8]  }
  0x24   :  { %s59_s18 = sshll.u32 %s664_s17, 4  ;;  %s60_s18 = int_to_ptr.vmem [resolvable:$true] %s59_s18 }
  0x25   :  { %s619_s19 = scalar_lea.vmem %s60_s18, 2048  ;;  %p624_p2 = scmp.lt.s32.totalorder %s60_s18, %s60_s18 }
  0x26   :  { %p620_p1 = scmp.ne.s32.totalorder %s60_s18, %s619_s19  ;;  %p625_p3 = scmp.lt.s32.totalorder %s619_s19, %s619_s19 }
  0x28   :  { %p626_p4 = por %p625_p3, %p624_p2 }
  0x2a   :  { %p627_p5 = pnand %p626_p4, %p620_p1 }
  0x2c   :  { %630 = shalt.err (!%p627_p5)
}
  0x2d   :  { %65 = dma.hbm_to_vmem [thread:$0]  %s800_s5, 2048, %s60_s18, [#allocation9], %s660_s27, %s660_s27, %s661_s28  }
  0x2e   :  { %651 = dma.done.wait [#allocation3], 128  }
  0x2f   :  { %652 = vsyncadd [#allocation3], 4294967168 }
  0x30   :  { %653 = dma.done.wait [#allocation6], 4096  }
  0x31   :  { %654 = vsyncadd [#allocation6], 4294963200 }
  0x32   :  { %655 = dma.done.wait [#allocation9], 2048  }
  0x33   :  { %656 = vsyncadd [#allocation9], 4294965248  ;;  %v665_v0 = vmov 0.0   ;;  %vm666_vm0 = vmmov 0   ;;  %v96_v1 = vld [vmem:[#allocation5 + $0x78] sm:$0xff]  ;;  %v95_v2 = vld [vmem:[#allocation5 + $0x70] sm:$0xff] }
  0x34   :  { %435 = vmatprep.subr.mxu0 %v665_v0  ;;  %467 = vmatprep.mubr.msk.f32.mxu0 %vm666_vm0, %v665_v0  ;;  %v94_v3 = vld [vmem:[#allocation5 + $0x68] sm:$0xff]  ;;  %v93_v4 = vld [vmem:[#allocation5 + $0x60] sm:$0xff]  ;;  %v190_v5 = vld [vmem:[#allocation7 + $0x78] sm:$0xff]  ;;  %s667_s24 = smov [#allocation10]  }
  0x35   :  { %470 = vmatprep.subr.mxu1 %v665_v0  ;;  %502 = vmatprep.mubr.msk.f32.mxu1 %vm666_vm0, %v665_v0  ;;  %v92_v6 = vld [vmem:[#allocation5 + $0x58] sm:$0xff]  ;;  %v189_v7 = vld [vmem:[#allocation7 + $0x70] sm:$0xff]  ;;  %v188_v8 = vld [vmem:[#allocation7 + $0x68] sm:$0xff]  ;;  %s370_s25 = sshll.u32 %s667_s24, 4  ;;  %s371_s25 = int_to_ptr.vmem [resolvable:$true] %s370_s25 }
  0x36   :  { %436 = vmatpush3.msra.mxu0 %v96_v1  ;;  %471 = vmatpush3.msra.mxu1 %v190_v5  ;;  %v91_v9 = vld [vmem:[#allocation5 + $0x50] sm:$0xff]  ;;  %v187_v10 = vld [vmem:[#allocation7 + $0x60] sm:$0xff]  ;;  %v90_v11 = vld [vmem:[#allocation5 + $0x48] sm:$0xff]  ;;  %s631_s26 = scalar_lea.vmem %s371_s25, 128  ;;  %p636_p7 = scmp.lt.s32.totalorder %s371_s25, %s371_s25 }
  0x37   :  { %437 = vmatprep.subr.mxu0 %v665_v0  ;;  %472 = vmatprep.subr.mxu1 %v665_v0  ;;  %v186_v12 = vld [vmem:[#allocation7 + $0x58] sm:$0xff]  ;;  %v89_v13 = vld [vmem:[#allocation5 + $0x40] sm:$0xff]  ;;  %v185_v14 = vld [vmem:[#allocation7 + $0x50] sm:$0xff]  ;;  %p632_p6 = scmp.ne.s32.totalorder %s371_s25, %s631_s26  ;;  %p637_p8 = scmp.lt.s32.totalorder %s631_s26, %s631_s26 }
  0x38   :  { %438 = vmatpush3.msra.mxu0 %v95_v2  ;;  %473 = vmatpush3.msra.mxu1 %v189_v7  ;;  %v88_v15 = vld [vmem:[#allocation5 + $0x38] sm:$0xff]  ;;  %v184_v16 = vld [vmem:[#allocation7 + $0x48] sm:$0xff]  ;;  %v87_v17 = vld [vmem:[#allocation5 + $0x30] sm:$0xff] }
  0x39   :  { %439 = vmatprep.subr.mxu0 %v665_v0  ;;  %474 = vmatprep.subr.mxu1 %v665_v0  ;;  %v183_v18 = vld [vmem:[#allocation7 + $0x40] sm:$0xff]  ;;  %v86_v19 = vld [vmem:[#allocation5 + $0x28] sm:$0xff]  ;;  %v182_v20 = vld [vmem:[#allocation7 + $0x38] sm:$0xff]  ;;  %p638_p9 = por %p637_p8, %p636_p7 }
  0x3a   :  { %440 = vmatpush3.msra.mxu0 %v94_v3  ;;  %475 = vmatpush3.msra.mxu1 %v188_v8  ;;  %v85_v21 = vld [vmem:[#allocation5 + $0x20] sm:$0xff]  ;;  %v181_v22 = vld [vmem:[#allocation7 + $0x30] sm:$0xff]  ;;  %v84_v23 = vld [vmem:[#allocation5 + $0x18] sm:$0xff] }
  0x3b   :  { %441 = vmatprep.subr.mxu0 %v665_v0  ;;  %476 = vmatprep.subr.mxu1 %v665_v0  ;;  %v180_v24 = vld [vmem:[#allocation7 + $0x28] sm:$0xff]  ;;  %v83_v25 = vld [vmem:[#allocation5 + $0x10] sm:$0xff]  ;;  %v179_v26 = vld [vmem:[#allocation7 + $0x20] sm:$0xff]  ;;  %p639_p10 = pnand %p638_p9, %p632_p6 }
  0x3c   :  { %442 = vmatpush3.msra.mxu0 %v93_v4  ;;  %477 = vmatpush3.msra.mxu1 %v187_v10  ;;  %v82_v27 = vld [vmem:[#allocation5 + $0x8] sm:$0xff]  ;;  %v178_v28 = vld [vmem:[#allocation7 + $0x18] sm:$0xff]  ;;  %v81_v29 = vld [vmem:[#allocation5] sm:$0xff] }
  0x3d   :  { %443 = vmatprep.subr.mxu0 %v665_v0  ;;  %478 = vmatprep.subr.mxu1 %v665_v0  ;;  %v80_v30 = vld [vmem:[#allocation2] sm:$0xff]  ;;  %v177_v31 = vld [vmem:[#allocation7 + $0x10] sm:$0xff]  ;;  %v176_v32 = vld [vmem:[#allocation7 + $0x8] sm:$0xff] }
  0x3e   :  { %444 = vmatpush3.msra.mxu0 %v92_v6  ;;  %479 = vmatpush3.msra.mxu1 %v186_v12  ;;  %v175_v33 = vld [vmem:[#allocation7] sm:$0xff]  ;;  %v284_v34 = vld [vmem:[#allocation8 + $0x78] sm:$0xff]  ;;  %v283_v35 = vld [vmem:[#allocation8 + $0x70] sm:$0xff] }
  0x3f   :  { %445 = vmatprep.subr.mxu0 %v665_v0  ;;  %480 = vmatprep.subr.mxu1 %v665_v0  ;;  %v282_v36 = vld [vmem:[#allocation8 + $0x68] sm:$0xff]  ;;  %v281_v37 = vld [vmem:[#allocation8 + $0x60] sm:$0xff]  ;;  %v280_v38 = vld [vmem:[#allocation8 + $0x58] sm:$0xff] }
  0x40   :  { %446 = vmatpush3.msra.mxu0 %v91_v9  ;;  %481 = vmatpush3.msra.mxu1 %v185_v14  ;;  %v279_v39 = vld [vmem:[#allocation8 + $0x50] sm:$0xff]  ;;  %v278_v40 = vld [vmem:[#allocation8 + $0x48] sm:$0xff]  ;;  %v277_v41 = vld [vmem:[#allocation8 + $0x40] sm:$0xff] }
  0x41   :  { %447 = vmatprep.subr.mxu0 %v665_v0  ;;  %482 = vmatprep.subr.mxu1 %v665_v0  ;;  %v276_v42 = vld [vmem:[#allocation8 + $0x38] sm:$0xff]  ;;  %v275_v43 = vld [vmem:[#allocation8 + $0x30] sm:$0xff]  ;;  %v274_v44 = vld [vmem:[#allocation8 + $0x28] sm:$0xff] }
  0x42   :  { %448 = vmatpush3.msra.mxu0 %v90_v11  ;;  %483 = vmatpush3.msra.mxu1 %v184_v16  ;;  %v273_v45 = vld [vmem:[#allocation8 + $0x20] sm:$0xff]  ;;  %v272_v46 = vld [vmem:[#allocation8 + $0x18] sm:$0xff]  ;;  %v271_v52 = vld [vmem:[#allocation8 + $0x10] sm:$0xff] }
  0x43   :  { %449 = vmatprep.subr.mxu0 %v665_v0  ;;  %484 = vmatprep.subr.mxu1 %v665_v0  ;;  %v381_v47 = vld [vmem:[%s797_s2] ss:$0 sm:$0xff]  ;;  %v270_v53 = vld [vmem:[#allocation8 + $0x8] sm:$0xff]  ;;  %v269_v54 = vld [vmem:[#allocation8] sm:$0xff] }
  0x44   :  { %450 = vmatpush3.msra.mxu0 %v89_v13  ;;  %485 = vmatpush3.msra.mxu1 %v183_v18  ;;  %v382_v55 = vld [vmem:[%s799_s4] ss:$0 sm:$0xff] }
  0x45   :  { %451 = vmatprep.subr.mxu0 %v665_v0  ;;  %486 = vmatprep.subr.mxu1 %v665_v0  ;;  %v383_v60 = vld [vmem:[%s801_s6] ss:$0 sm:$0xff] }
  0x46   :  { %452 = vmatpush3.msra.mxu0 %v88_v15  ;;  %487 = vmatpush3.msra.mxu1 %v182_v20 }
  0x47   :  { %453 = vmatprep.subr.mxu0 %v665_v0  ;;  %488 = vmatprep.subr.mxu1 %v665_v0 }
  0x48   :  { %454 = vmatpush3.msra.mxu0 %v87_v17  ;;  %489 = vmatpush3.msra.mxu1 %v181_v22 }
  0x49   :  { %455 = vmatprep.subr.mxu0 %v665_v0  ;;  %490 = vmatprep.subr.mxu1 %v665_v0 }
  0x4a   :  { %456 = vmatpush3.msra.mxu0 %v86_v19  ;;  %491 = vmatpush3.msra.mxu1 %v180_v24 }
  0x4b   :  { %457 = vmatprep.subr.mxu0 %v665_v0  ;;  %492 = vmatprep.subr.mxu1 %v665_v0 }
  0x4c   :  { %458 = vmatpush3.msra.mxu0 %v85_v21  ;;  %493 = vmatpush3.msra.mxu1 %v179_v26 }
  0x4d   :  { %459 = vmatprep.subr.mxu0 %v665_v0  ;;  %494 = vmatprep.subr.mxu1 %v665_v0 }
  0x4e   :  { %460 = vmatpush3.msra.mxu0 %v84_v23  ;;  %495 = vmatpush3.msra.mxu1 %v178_v28 }
  0x4f   :  { %461 = vmatprep.subr.mxu0 %v665_v0  ;;  %496 = vmatprep.subr.mxu1 %v665_v0 }
  0x50   :  { %462 = vmatpush3.msra.mxu0 %v83_v25  ;;  %497 = vmatpush3.msra.mxu1 %v177_v31 }
  0x51   :  { %463 = vmatprep.subr.mxu0 %v665_v0  ;;  %498 = vmatprep.subr.mxu1 %v665_v0 }
  0x52   :  { %464 = vmatpush3.msra.mxu0 %v82_v27  ;;  %499 = vmatpush3.msra.mxu1 %v176_v32 }
  0x53   :  { %465 = vmatprep.subr.mxu0 %v665_v0  ;;  %500 = vmatprep.subr.mxu1 %v665_v0 }
  0x54   :  { %466 = vmatpush3.msra.mxu0 %v81_v29  ;;  %501 = vmatpush3.msra.mxu1 %v175_v33 }
  0x55   :  { %468 = vmatmul.mubr.f32.vlgmr.msra.gmra.mxu0 %v80_v30  ;;  %505 = vmatprep.subr.mxu0 %v665_v0 }
  0x56   :  { %537 = vmatprep.mubr.msk.f32.mxu0 %vm666_vm0, %v665_v0  ;;  %506 = vmatpush3.msra.mxu0 %v284_v34 }
  0x57   :  { %507 = vmatprep.subr.mxu0 %v665_v0 }
  0x58   :  { %508 = vmatpush3.msra.mxu0 %v283_v35 }
  0x59   :  { %509 = vmatprep.subr.mxu0 %v665_v0 }
  0x5a   :  { %510 = vmatpush3.msra.mxu0 %v282_v36 }
  0x5b   :  { %511 = vmatprep.subr.mxu0 %v665_v0 }
  0x5c   :  { %512 = vmatpush3.msra.mxu0 %v281_v37 }
  0x5d   :  { %513 = vmatprep.subr.mxu0 %v665_v0 }
  0x5e   :  { %514 = vmatpush3.msra.mxu0 %v280_v38 }
  0x5f   :  { %515 = vmatprep.subr.mxu0 %v665_v0 }
  0x60   :  { %516 = vmatpush3.msra.mxu0 %v279_v39 }
  0x61   :  { %517 = vmatprep.subr.mxu0 %v665_v0 }
  0x62   :  { %518 = vmatpush3.msra.mxu0 %v278_v40 }
  0x63   :  { %519 = vmatprep.subr.mxu0 %v665_v0 }
  0x64   :  { %520 = vmatpush3.msra.mxu0 %v277_v41 }
  0x65   :  { %521 = vmatprep.subr.mxu0 %v665_v0 }
  0x66   :  { %522 = vmatpush3.msra.mxu0 %v276_v42 }
  0x67   :  { %523 = vmatprep.subr.mxu0 %v665_v0 }
  0x68   :  { %524 = vmatpush3.msra.mxu0 %v275_v43 }
  0x69   :  { %525 = vmatprep.subr.mxu0 %v665_v0 }
  0x6a   :  { %526 = vmatpush3.msra.mxu0 %v274_v44 }
  0x6b   :  { %527 = vmatprep.subr.mxu0 %v665_v0 }
  0x6c   :  { %528 = vmatpush3.msra.mxu0 %v273_v45 }
  0x6d   :  { %529 = vmatprep.subr.mxu0 %v665_v0 }
  0x6e   :  { %530 = vmatpush3.msra.mxu0 %v272_v46 }
  0x6f   :  { %531 = vmatprep.subr.mxu0 %v665_v0 }
  0x70   :  { %532 = vmatpush3.msra.mxu0 %v271_v52 }
  0x71   :  { %533 = vmatprep.subr.mxu0 %v665_v0 }
  0x72   :  { %534 = vmatpush3.msra.mxu0 %v270_v53 }
  0x73   :  { %535 = vmatprep.subr.mxu0 %v665_v0 }
  0x74   :  { %536 = vmatpush3.msra.mxu0 %v269_v54 }
 0x115   :  { %v170_v48 = vpop.f32.mrf.mxu0 }
 0x116   :  { %v171_v49 = vadd.f32 %v381_v47, %v170_v48 }
 0x117   :  { %v469_v50 = vpop.f32.mrf.mxu0 }
 0x118   :  { %v174_v51 = vmax.f32 %v171_v49, 0.0 }
 0x11a   :  { %503 = vmatmul.mubr.f32.vlgmr.msra.gmra.mxu1 %v174_v51 }
 0x1da   :  { %v264_v56 = vpop.f32.mrf.mxu1 }
 0x1db   :  { %v265_v57 = vadd.f32 %v382_v55, %v264_v56 }
 0x1dc   :  { %v504_v58 = vpop.f32.mrf.mxu1 }
 0x1dd   :  { %v268_v59 = vmax.f32 %v265_v57, 0.0 }
 0x1df   :  { %538 = vmatmul.mubr.f32.vlgmr.msra.gmra.mxu0 %v268_v59 }
 0x29f   :  { %v358_v61 = vpop.f32.mrf.mxu0 }
 0x2a0   :  { %v359_v62 = vadd.f32 %v383_v60, %v358_v61 }
 0x2a1   :  { %v539_v63 = vpop.f32.mrf.mxu0 }
 0x2a2   :  { %549 = vtanh.f32 %v359_v62 }
 0x2af   :  { %v550_v0 = vpop.eup %549 }
 0x2b0   :  { %363 = vst [vmem:[#allocation10] sm:$0xff] %v550_v0 }
 0x2b1   :  { %642 = shalt.err (!%p639_p10)
}
 0x2b2   :  { %373 = dma.vmem_to_hbm [thread:$0]  %s371_s25, 128, %s802_s7, [#allocation4]  }
 0x2b3   :  { %657 = dma.done.wait [#allocation4], 128  }
 0x2b4   :  { %658 = vsyncadd [#allocation4], 4294967168 }
 0x2b5   :  { %377 = vsyncpa [#allocation3], 1 }
 0x2b6   :  { %378 = vsyncpa [#allocation6], 1 }
 0x2b7   :  { %379 = vsyncpa [#allocation9], 1 }
 0x2b8   :  { %380 = vsyncpa [#allocation4], 1 }

// kernel: tpu_custom_call.1
= control target key start
LH: loop header
LB: loop body
LE: loop exit
PB: predicated region body
PF: predicated region fallthrough
CT: control target
= control target key end

     0   :  { %12 = vsyncpa [#allocation3], 0  ;;  %s795_s0 = inlined_call_operand.hbm [shape: f32[8,128], index: 0, kind: input, shape index: {}]   ;;  %s796_s1 = inlined_call_operand.hbm [shape: f32[128,128], index: 1, kind: input, shape index: {}]   ;;  %s797_s2 = inlined_call_operand.vmem [shape: f32[1,128], index: 2, kind: input, shape index: {}]   ;;  %s798_s3 = inlined_call_operand.hbm [shape: f32[128,128], index: 3, kind: input, shape index: {}]   ;;  %s799_s4 = inlined_call_operand.vmem [shape: f32[1,128], index: 4, kind: input, shape index: {}]   ;;  %s800_s5 = inlined_call_operand.hbm [shape: f32[128,128], index: 5, kind: input, shape index: {}]   ;;  %s801_s6 = inlined_call_operand.vmem [shape: f32[1,128], index: 6, kind: input, shape index: {}]   ;;  %s802_s7 = inlined_call_operand.hbm [shape: f32[8,128], index: 7, kind: output, shape index: {}]  }
   0x1   :  { %13 = vsyncpa [#allocation6], 0 }
   0x2   :  { %14 = vsyncpa [#allocation9], 0 }
   0x3   :  { %15 = vsyncpa [#allocation4], 0  ;;  %s659_s24 = smov [#allocation5]  }
   0x4   :  { %s31_s25 = sshll.u32 %s659_s24, 4  ;;  %s32_s25 = int_to_ptr.vmem [resolvable:$true] %s31_s25 }
   0x5   :  { %s559_s26 = scalar_lea.vmem %s32_s25, 2048  ;;  %p564_p1 = scmp.lt.s32.totalorder %s32_s25, %s32_s25 }
   0x6   :  { %p560_p0 = scmp.ne.s32.totalorder %s32_s25, %s559_s26  ;;  %p565_p2 = scmp.lt.s32.totalorder %s559_s26, %s559_s26 }
   0x8   :  { %p566_p3 = por %p565_p2, %p564_p1 }
   0xa   :  { %p567_p4 = pnand %p566_p3, %p560_p0 }
   0xc   :  { %570 = shalt.err (!%p567_p4)
}
   0xd   :  { %s660_s27 = smov 128   ;;  %s661_s28 = smov 8  }
   0xe   :  { %37 = dma.hbm_to_vmem [thread:$0]  %s796_s1, 2048, %s32_s25, [#allocation6], %s660_s27, %s660_s27, %s661_s28  }
   0xf   :  { %s662_s8 = smov [#allocation2]   ;;  %s663_s10 = smov [#allocation7]  }
  0x10   :  { %s22_s9 = sshll.u32 %s662_s8, 4  ;;  %s45_s11 = sshll.u32 %s663_s10, 4  ;;  %s23_s9 = int_to_ptr.vmem [resolvable:$true] %s22_s9  ;;  %s46_s11 = int_to_ptr.vmem [resolvable:$true] %s45_s11 }
  0x11   :  { %s579_s12 = scalar_lea.vmem %s23_s9, 128  ;;  %p584_p6 = scmp.lt.s32.totalorder %s23_s9, %s23_s9 }
  0x12   :  { %p580_p5 = scmp.ne.s32.totalorder %s23_s9, %s579_s12  ;;  %p585_p7 = scmp.lt.s32.totalorder %s579_s12, %s579_s12 }
  0x14   :  { %p586_p8 = por %p585_p7, %p584_p6 }
  0x16   :  { %p587_p9 = pnand %p586_p8, %p580_p5 }
  0x18   :  { %590 = shalt.err (!%p587_p9)
}
  0x19   :  { %25 = dma.hbm_to_vmem [thread:$0]  %s795_s0, 128, %s23_s9, [#allocation3]  }
  0x1a   :  { %s599_s15 = scalar_lea.vmem %s46_s11, 2048  ;;  %p604_p11 = scmp.lt.s32.totalorder %s46_s11, %s46_s11 }
  0x1b   :  { %p600_p10 = scmp.ne.s32.totalorder %s46_s11, %s599_s15  ;;  %p605_p12 = scmp.lt.s32.totalorder %s599_s15, %s599_s15 }
  0x1d   :  { %p606_p13 = por %p605_p12, %p604_p11 }
  0x1f   :  { %p607_p0 = pnand %p606_p13, %p600_p10 }
  0x21   :  { %610 = shalt.err (!%p607_p0)
}
  0x22   :  { %51 = dma.hbm_to_vmem [thread:$0]  %s798_s3, 2048, %s46_s11, [#allocation6], %s660_s27, %s660_s27, %s661_s28  }
  0x23   :  { %s664_s17 = smov [#allocation8]  }
  0x24   :  { %s59_s18 = sshll.u32 %s664_s17, 4  ;;  %s60_s18 = int_to_ptr.vmem [resolvable:$true] %s59_s18 }
  0x25   :  { %s619_s19 = scalar_lea.vmem %s60_s18, 2048  ;;  %p624_p2 = scmp.lt.s32.totalorder %s60_s18, %s60_s18 }
  0x26   :  { %p620_p1 = scmp.ne.s32.totalorder %s60_s18, %s619_s19  ;;  %p625_p3 = scmp.lt.s32.totalorder %s619_s19, %s619_s19 }
  0x28   :  { %p626_p4 = por %p625_p3, %p624_p2 }
  0x2a   :  { %p627_p5 = pnand %p626_p4, %p620_p1 }
  0x2c   :  { %630 = shalt.err (!%p627_p5)
}
  0x2d   :  { %65 = dma.hbm_to_vmem [thread:$0]  %s800_s5, 2048, %s60_s18, [#allocation9], %s660_s27, %s660_s27, %s661_s28  }
  0x2e   :  { %651 = dma.done.wait [#allocation3], 128  }
  0x2f   :  { %652 = vsyncadd [#allocation3], 4294967168 }
  0x30   :  { %653 = dma.done.wait [#allocation6], 4096  }
  0x31   :  { %654 = vsyncadd [#allocation6], 4294963200 }
  0x32   :  { %655 = dma.done.wait [#allocation9], 2048  }
  0x33   :  { %656 = vsyncadd [#allocation9], 4294965248  ;;  %v665_v0 = vmov 0.0   ;;  %vm666_vm0 = vmmov 0   ;;  %v96_v1 = vld [vmem:[#allocation5 + $0x78] sm:$0xff]  ;;  %v95_v2 = vld [vmem:[#allocation5 + $0x70] sm:$0xff] }
  0x34   :  { %435 = vmatprep.subr.mxu0 %v665_v0  ;;  %467 = vmatprep.mubr.msk.f32.mxu0 %vm666_vm0, %v665_v0  ;;  %v94_v3 = vld [vmem:[#allocation5 + $0x68] sm:$0xff]  ;;  %v93_v4 = vld [vmem:[#allocation5 + $0x60] sm:$0xff]  ;;  %v190_v5 = vld [vmem:[#allocation7 + $0x78] sm:$0xff]  ;;  %s667_s24 = smov [#allocation10]  }
  0x35   :  { %470 = vmatprep.subr.mxu1 %v665_v0  ;;  %502 = vmatprep.mubr.msk.f32.mxu1 %vm666_vm0, %v665_v0  ;;  %v92_v6 = vld [vmem:[#allocation5 + $0x58] sm:$0xff]  ;;  %v189_v7 = vld [vmem:[#allocation7 + $0x70] sm:$0xff]  ;;  %v188_v8 = vld [vmem:[#allocation7 + $0x68] sm:$0xff]  ;;  %s370_s25 = sshll.u32 %s667_s24, 4  ;;  %s371_s25 = int_to_ptr.vmem [resolvable:$true] %s370_s25 }
  0x36   :  { %436 = vmatpush3.msra.mxu0 %v96_v1  ;;  %471 = vmatpush3.msra.mxu1 %v190_v5  ;;  %v91_v9 = vld [vmem:[#allocation5 + $0x50] sm:$0xff]  ;;  %v187_v10 = vld [vmem:[#allocation7 + $0x60] sm:$0xff]  ;;  %v90_v11 = vld [vmem:[#allocation5 + $0x48] sm:$0xff]  ;;  %s631_s26 = scalar_lea.vmem %s371_s25, 128  ;;  %p636_p7 = scmp.lt.s32.totalorder %s371_s25, %s371_s25 }
  0x37   :  { %437 = vmatprep.subr.mxu0 %v665_v0  ;;  %472 = vmatprep.subr.mxu1 %v665_v0  ;;  %v186_v12 = vld [vmem:[#allocation7 + $0x58] sm:$0xff]  ;;  %v89_v13 = vld [vmem:[#allocation5 + $0x40] sm:$0xff]  ;;  %v185_v14 = vld [vmem:[#allocation7 + $0x50] sm:$0xff]  ;;  %p632_p6 = scmp.ne.s32.totalorder %s371_s25, %s631_s26  ;;  %p637_p8 = scmp.lt.s32.totalorder %s631_s26, %s631_s26 }
  0x38   :  { %438 = vmatpush3.msra.mxu0 %v95_v2  ;;  %473 = vmatpush3.msra.mxu1 %v189_v7  ;;  %v88_v15 = vld [vmem:[#allocation5 + $0x38] sm:$0xff]  ;;  %v184_v16 = vld [vmem:[#allocation7 + $0x48] sm:$0xff]  ;;  %v87_v17 = vld [vmem:[#allocation5 + $0x30] sm:$0xff] }
  0x39   :  { %439 = vmatprep.subr.mxu0 %v665_v0  ;;  %474 = vmatprep.subr.mxu1 %v665_v0  ;;  %v183_v18 = vld [vmem:[#allocation7 + $0x40] sm:$0xff]  ;;  %v86_v19 = vld [vmem:[#allocation5 + $0x28] sm:$0xff]  ;;  %v182_v20 = vld [vmem:[#allocation7 + $0x38] sm:$0xff]  ;;  %p638_p9 = por %p637_p8, %p636_p7 }
  0x3a   :  { %440 = vmatpush3.msra.mxu0 %v94_v3  ;;  %475 = vmatpush3.msra.mxu1 %v188_v8  ;;  %v85_v21 = vld [vmem:[#allocation5 + $0x20] sm:$0xff]  ;;  %v181_v22 = vld [vmem:[#allocation7 + $0x30] sm:$0xff]  ;;  %v84_v23 = vld [vmem:[#allocation5 + $0x18] sm:$0xff] }
  0x3b   :  { %441 = vmatprep.subr.mxu0 %v665_v0  ;;  %476 = vmatprep.subr.mxu1 %v665_v0  ;;  %v180_v24 = vld [vmem:[#allocation7 + $0x28] sm:$0xff]  ;;  %v83_v25 = vld [vmem:[#allocation5 + $0x10] sm:$0xff]  ;;  %v179_v26 = vld [vmem:[#allocation7 + $0x20] sm:$0xff]  ;;  %p639_p10 = pnand %p638_p9, %p632_p6 }
  0x3c   :  { %442 = vmatpush3.msra.mxu0 %v93_v4  ;;  %477 = vmatpush3.msra.mxu1 %v187_v10  ;;  %v82_v27 = vld [vmem:[#allocation5 + $0x8] sm:$0xff]  ;;  %v178_v28 = vld [vmem:[#allocation7 + $0x18] sm:$0xff]  ;;  %v81_v29 = vld [vmem:[#allocation5] sm:$0xff] }
  0x3d   :  { %443 = vmatprep.subr.mxu0 %v665_v0  ;;  %478 = vmatprep.subr.mxu1 %v665_v0  ;;  %v80_v30 = vld [vmem:[#allocation2] sm:$0xff]  ;;  %v177_v31 = vld [vmem:[#allocation7 + $0x10] sm:$0xff]  ;;  %v176_v32 = vld [vmem:[#allocation7 + $0x8] sm:$0xff] }
  0x3e   :  { %444 = vmatpush3.msra.mxu0 %v92_v6  ;;  %479 = vmatpush3.msra.mxu1 %v186_v12  ;;  %v175_v33 = vld [vmem:[#allocation7] sm:$0xff]  ;;  %v284_v34 = vld [vmem:[#allocation8 + $0x78] sm:$0xff]  ;;  %v283_v35 = vld [vmem:[#allocation8 + $0x70] sm:$0xff] }
  0x3f   :  { %445 = vmatprep.subr.mxu0 %v665_v0  ;;  %480 = vmatprep.subr.mxu1 %v665_v0  ;;  %v282_v36 = vld [vmem:[#allocation8 + $0x68] sm:$0xff]  ;;  %v281_v37 = vld [vmem:[#allocation8 + $0x60] sm:$0xff]  ;;  %v280_v38 = vld [vmem:[#allocation8 + $0x58] sm:$0xff] }
  0x40   :  { %446 = vmatpush3.msra.mxu0 %v91_v9  ;;  %481 = vmatpush3.msra.mxu1 %v185_v14  ;;  %v279_v39 = vld [vmem:[#allocation8 + $0x50] sm:$0xff]  ;;  %v278_v40 = vld [vmem:[#allocation8 + $0x48] sm:$0xff]  ;;  %v277_v41 = vld [vmem:[#allocation8 + $0x40] sm:$0xff] }
  0x41   :  { %447 = vmatprep.subr.mxu0 %v665_v0  ;;  %482 = vmatprep.subr.mxu1 %v665_v0  ;;  %v276_v42 = vld [vmem:[#allocation8 + $0x38] sm:$0xff]  ;;  %v275_v43 = vld [vmem:[#allocation8 + $0x30] sm:$0xff]  ;;  %v274_v44 = vld [vmem:[#allocation8 + $0x28] sm:$0xff] }
  0x42   :  { %448 = vmatpush3.msra.mxu0 %v90_v11  ;;  %483 = vmatpush3.msra.mxu1 %v184_v16  ;;  %v273_v45 = vld [vmem:[#allocation8 + $0x20] sm:$0xff]  ;;  %v272_v46 = vld [vmem:[#allocation8 + $0x18] sm:$0xff]  ;;  %v271_v52 = vld [vmem:[#allocation8 + $0x10] sm:$0xff] }
  0x43   :  { %449 = vmatprep.subr.mxu0 %v665_v0  ;;  %484 = vmatprep.subr.mxu1 %v665_v0  ;;  %v381_v47 = vld [vmem:[%s797_s2] ss:$0 sm:$0xff]  ;;  %v270_v53 = vld [vmem:[#allocation8 + $0x8] sm:$0xff]  ;;  %v269_v54 = vld [vmem:[#allocation8] sm:$0xff] }
  0x44   :  { %450 = vmatpush3.msra.mxu0 %v89_v13  ;;  %485 = vmatpush3.msra.mxu1 %v183_v18  ;;  %v382_v55 = vld [vmem:[%s799_s4] ss:$0 sm:$0xff] }
  0x45   :  { %451 = vmatprep.subr.mxu0 %v665_v0  ;;  %486 = vmatprep.subr.mxu1 %v665_v0  ;;  %v383_v60 = vld [vmem:[%s801_s6] ss:$0 sm:$0xff] }
  0x46   :  { %452 = vmatpush3.msra.mxu0 %v88_v15  ;;  %487 = vmatpush3.msra.mxu1 %v182_v20 }
  0x47   :  { %453 = vmatprep.subr.mxu0 %v665_v0  ;;  %488 = vmatprep.subr.mxu1 %v665_v0 }
  0x48   :  { %454 = vmatpush3.msra.mxu0 %v87_v17  ;;  %489 = vmatpush3.msra.mxu1 %v181_v22 }
  0x49   :  { %455 = vmatprep.subr.mxu0 %v665_v0  ;;  %490 = vmatprep.subr.mxu1 %v665_v0 }
  0x4a   :  { %456 = vmatpush3.msra.mxu0 %v86_v19  ;;  %491 = vmatpush3.msra.mxu1 %v180_v24 }
  0x4b   :  { %457 = vmatprep.subr.mxu0 %v665_v0  ;;  %492 = vmatprep.subr.mxu1 %v665_v0 }
  0x4c   :  { %458 = vmatpush3.msra.mxu0 %v85_v21  ;;  %493 = vmatpush3.msra.mxu1 %v179_v26 }
  0x4d   :  { %459 = vmatprep.subr.mxu0 %v665_v0  ;;  %494 = vmatprep.subr.mxu1 %v665_v0 }
  0x4e   :  { %460 = vmatpush3.msra.mxu0 %v84_v23  ;;  %495 = vmatpush3.msra.mxu1 %v178_v28 }
  0x4f   :  { %461 = vmatprep.subr.mxu0 %v665_v0  ;;  %496 = vmatprep.subr.mxu1 %v665_v0 }
  0x50   :  { %462 = vmatpush3.msra.mxu0 %v83_v25  ;;  %497 = vmatpush3.msra.mxu1 %v177_v31 }
  0x51   :  { %463 = vmatprep.subr.mxu0 %v665_v0  ;;  %498 = vmatprep.subr.mxu1 %v665_v0 }
  0x52   :  { %464 = vmatpush3.msra.mxu0 %v82_v27  ;;  %499 = vmatpush3.msra.mxu1 %v176_v32 }
  0x53   :  { %465 = vmatprep.subr.mxu0 %v665_v0  ;;  %500 = vmatprep.subr.mxu1 %v665_v0 }
  0x54   :  { %466 = vmatpush3.msra.mxu0 %v81_v29  ;;  %501 = vmatpush3.msra.mxu1 %v175_v33 }
  0x55   :  { %468 = vmatmul.mubr.f32.vlgmr.msra.gmra.mxu0 %v80_v30  ;;  %505 = vmatprep.subr.mxu0 %v665_v0 }
  0x56   :  { %537 = vmatprep.mubr.msk.f32.mxu0 %vm666_vm0, %v665_v0  ;;  %506 = vmatpush3.msra.mxu0 %v284_v34 }
  0x57   :  { %507 = vmatprep.subr.mxu0 %v665_v0 }
  0x58   :  { %508 = vmatpush3.msra.mxu0 %v283_v35 }
  0x59   :  { %509 = vmatprep.subr.mxu0 %v665_v0 }
  0x5a   :  { %510 = vmatpush3.msra.mxu0 %v282_v36 }
  0x5b   :  { %511 = vmatprep.subr.mxu0 %v665_v0 }
  0x5c   :  { %512 = vmatpush3.msra.mxu0 %v281_v37 }
  0x5d   :  { %513 = vmatprep.subr.mxu0 %v665_v0 }
  0x5e   :  { %514 = vmatpush3.msra.mxu0 %v280_v38 }
  0x5f   :  { %515 = vmatprep.subr.mxu0 %v665_v0 }
  0x60   :  { %516 = vmatpush3.msra.mxu0 %v279_v39 }
  0x61   :  { %517 = vmatprep.subr.mxu0 %v665_v0 }
  0x62   :  { %518 = vmatpush3.msra.mxu0 %v278_v40 }
  0x63   :  { %519 = vmatprep.subr.mxu0 %v665_v0 }
  0x64   :  { %520 = vmatpush3.msra.mxu0 %v277_v41 }
  0x65   :  { %521 = vmatprep.subr.mxu0 %v665_v0 }
  0x66   :  { %522 = vmatpush3.msra.mxu0 %v276_v42 }
  0x67   :  { %523 = vmatprep.subr.mxu0 %v665_v0 }
  0x68   :  { %524 = vmatpush3.msra.mxu0 %v275_v43 }
  0x69   :  { %525 = vmatprep.subr.mxu0 %v665_v0 }
  0x6a   :  { %526 = vmatpush3.msra.mxu0 %v274_v44 }
  0x6b   :  { %527 = vmatprep.subr.mxu0 %v665_v0 }
  0x6c   :  { %528 = vmatpush3.msra.mxu0 %v273_v45 }
  0x6d   :  { %529 = vmatprep.subr.mxu0 %v665_v0 }
  0x6e   :  { %530 = vmatpush3.msra.mxu0 %v272_v46 }
  0x6f   :  { %531 = vmatprep.subr.mxu0 %v665_v0 }
  0x70   :  { %532 = vmatpush3.msra.mxu0 %v271_v52 }
  0x71   :  { %533 = vmatprep.subr.mxu0 %v665_v0 }
  0x72   :  { %534 = vmatpush3.msra.mxu0 %v270_v53 }
  0x73   :  { %535 = vmatprep.subr.mxu0 %v665_v0 }
  0x74   :  { %536 = vmatpush3.msra.mxu0 %v269_v54 }
 0x115   :  { %v170_v48 = vpop.f32.mrf.mxu0 }
 0x116   :  { %v171_v49 = vadd.f32 %v381_v47, %v170_v48 }
 0x117   :  { %v469_v50 = vpop.f32.mrf.mxu0 }
 0x118   :  { %v174_v51 = vmax.f32 %v171_v49, 0.0 }
 0x11a   :  { %503 = vmatmul.mubr.f32.vlgmr.msra.gmra.mxu1 %v174_v51 }
 0x1da   :  { %v264_v56 = vpop.f32.mrf.mxu1 }
 0x1db   :  { %v265_v57 = vadd.f32 %v382_v55, %v264_v56 }
 0x1dc   :  { %v504_v58 = vpop.f32.mrf.mxu1 }
 0x1dd   :  { %v268_v59 = vmax.f32 %v265_v57, 0.0 }
 0x1df   :  { %538 = vmatmul.mubr.f32.vlgmr.msra.gmra.mxu0 %v268_v59 }
 0x29f   :  { %v358_v61 = vpop.f32.mrf.mxu0 }
 0x2a0   :  { %v359_v62 = vadd.f32 %v383_v60, %v358_v61 }
 0x2a1   :  { %v539_v63 = vpop.f32.mrf.mxu0 }
 0x2a2   :  { %549 = vtanh.f32 %v359_v62 }
 0x2af   :  { %v550_v0 = vpop.eup %549 }
 0x2b0   :  { %363 = vst [vmem:[#allocation10] sm:$0xff] %v550_v0 }
 0x2b1   :  { %642 = shalt.err (!%p639_p10)
}
 0x2b2   :  { %373 = dma.vmem_to_hbm [thread:$0]  %s371_s25, 128, %s802_s7, [#allocation4]  }
 0x2b3   :  { %657 = dma.done.wait [#allocation4], 128  }
 0x2b4   :  { %658 = vsyncadd [#allocation4], 4294967168 }
 0x2b5   :  { %377 = vsyncpa [#allocation3], 1 }
 0x2b6   :  { %378 = vsyncpa [#allocation6], 1 }
 0x2b7   :  { %379 = vsyncpa [#allocation9], 1 }
 0x2b8   :  { %380 = vsyncpa [#allocation4], 1 }

</bundles_post_ra>
